<compile_context>
chip_gen: v7x
topology: tpu7x:2x2x1
jax: 0.10.0
libtpu: 0.0.40
codegen_flags: <defaults>
</compile_context>

<pallas_src>
import jax
import jax.numpy as jnp
from jax.experimental import pallas as pl
from jax.experimental.pallas import tpu as pltpu

NUM_TOKENS = 36
EMB_SIZE = 36
HIDDEN = 100

LANE = 128      # lane width  (last-dim alignment)
SUBLANE = 8     # sublane     (second-to-last alignment)
NEG_BIG = -1e30


def _round_up(x, m):
    return (x + m - 1) // m * m


def char_rnn_seq_kernel(x_wx_ref, h0_ref, wh_ref, wl_ref, bl_ref,
                        logp_ref, hout_ref):
    """Whole T-step recurrence in one invocation; weights loaded once."""
    t_len, bp, _ = x_wx_ref.shape
    vp = wl_ref.shape[1]

    wh = wh_ref[...]                                   # resident [Hp, Hp]
    wl = wl_ref[...]                                   # resident [Hp, Vp]
    cdt = wh.dtype                                     # f32 or bf16 compute
    # Bias broadcast hoisted out of the loop (JAX does not CSE broadcasts).
    bl = jnp.broadcast_to(bl_ref[...], (bp, vp))       # [Bp, Vp] f32

    def step(t, h):
        # rnn_update: tanh(h @ Wh^T + x_emb @ Wx^T + b_upd); the embedding
        # half + bias are prefolded into the streamed x_wx[t].
        h_pre = (jnp.dot(h.astype(cdt), wh, preferred_element_type=jnp.float32)
                 + x_wx_ref[t])                        # [Bp, Hp] f32
        h_next = jnp.tanh(h_pre)
        # rnn_to_logits + log_softmax (padding lanes carry -1e30 in bl).
        logits = (jnp.dot(h_next.astype(cdt), wl,
                          preferred_element_type=jnp.float32) + bl)
        m = jnp.max(logits, axis=-1, keepdims=True)
        shifted = logits - m
        lse = jnp.log(jnp.sum(jnp.exp(shifted), axis=-1, keepdims=True))
        logp_ref[t] = shifted - lse
        return h_next

    # Hidden state carried in registers; final state stored exactly once.
    hout_ref[...] = jax.lax.fori_loop(0, t_len, step, h0_ref[...], unroll=True)


def prepare_params(emb, w_upd, b_upd, w_log, b_log,
                   compute_dtype=jnp.float32):
    """One-time weight prep: transpose, fold emb@Wx^T + b_upd, pad to (8,128)."""
    v, e = emb.shape
    h = w_log.shape[1]
    hp = _round_up(h, LANE)
    vp = _round_up(v, LANE)

    wh_t = jnp.transpose(w_upd[:, :h])                 # [H, H]  (in, out)
    wx_t = jnp.transpose(w_upd[:, h:])                 # [E, H]
    # Fold embedding lookup AND update bias into one [V, Hp] table; padded H
    # columns stay exactly zero so tanh(0)=0 keeps them inert in the carry.
    emb_wx = emb @ wx_t + b_upd[None, :]               # [V, H]
    emb_wx_b = jnp.zeros((v, hp), jnp.float32).at[:, :h].set(emb_wx)

    wl_t = jnp.transpose(w_log)                        # [H, V]
    wh_p = jnp.zeros((hp, hp), jnp.float32).at[:h, :h].set(wh_t)
    wl_p = jnp.zeros((hp, vp), jnp.float32).at[:h, :v].set(wl_t)
    bl_p = jnp.full((1, vp), NEG_BIG, jnp.float32).at[0, :v].set(b_log)

    return dict(emb_wx_b=emb_wx_b,
                wh=wh_p.astype(compute_dtype),
                wl=wl_p.astype(compute_dtype),
                bl=bl_p,
                compute_dtype=compute_dtype,
                H=h, V=v, HP=hp, VP=vp)


def char_rnn_sequence(ids_seq, h0, params):
    """Run the whole sequence in one pallas_call.

    ids_seq : [T, B] int   h0 : [B, H] f32
    returns (log_probs [T, B, V] f32, h_final [B, H] f32)
    """
    t_len, b = ids_seq.shape
    h, v, hp, vp = params["H"], params["V"], params["HP"], params["VP"]
    bp = _round_up(max(b, SUBLANE), SUBLANE)
    cdt = params["compute_dtype"]

    # Sequence-wide embedding gather (+ prefolded update bias), hoisted out of
    # the kernel: data-independent of the recurrence, done once.
    x_wx = params["emb_wx_b"][ids_seq.astype(jnp.int32)]          # [T, B, Hp]
    x_wx_p = jnp.zeros((t_len, bp, hp), cdt).at[:, :b, :].set(x_wx.astype(cdt))
    h0_p = jnp.zeros((bp, hp), jnp.float32).at[:b, :h].set(h0)

    vmem = pl.BlockSpec(memory_space=pltpu.MemorySpace.VMEM)

    logp_p, h_p = pl.pallas_call(
        char_rnn_seq_kernel,
        out_shape=(jax.ShapeDtypeStruct((t_len, bp, vp), jnp.float32),
                   jax.ShapeDtypeStruct((bp, hp), jnp.float32)),
        in_specs=[vmem, vmem, vmem, vmem, vmem],
        out_specs=(vmem, vmem),
    )(x_wx_p, h0_p, params["wh"], params["wl"], params["bl"])

    return logp_p[:, :b, :v], h_p[:b, :h]


def char_rnn_cell(ids, h_prev, params):
    """Module-equivalent single step: returns (h_next, log_probs)."""
    logp, h_next = char_rnn_sequence(ids[None, :], h_prev, params)
    return h_next, logp[0]


# ----------------------------- reference -----------------------------------
def reference_cell(ids, h_prev, emb, w_upd, b_upd, w_log, b_log):
    x_emb = emb[ids]
    x_and_h = jnp.concatenate([h_prev, x_emb], axis=-1)
    h_next = jnp.tanh(x_and_h @ w_upd.T + b_upd)
    logits = h_next @ w_log.T + b_log
    return h_next, jax.nn.log_softmax(logits, axis=-1)


def reference_sequence(ids_seq, h0, emb, w_upd, b_upd, w_log, b_log):
    h = h0
    lps = []
    for t in range(ids_seq.shape[0]):
        h, lp = reference_cell(ids_seq[t], h, emb, w_upd, b_upd, w_log, b_log)
        lps.append(lp)
    return jnp.stack(lps), h


if __name__ == "__main__":
    key = jax.random.PRNGKey(0)
    k_ids, k_h, k_emb, k_wu, k_bu, k_wl, k_bl = jax.random.split(key, 7)

    B, T = 2, 8
    fan_u = EMB_SIZE + HIDDEN
    bu_bound = fan_u ** -0.5
    bl_bound = HIDDEN ** -0.5

    emb = jax.random.normal(k_emb, (NUM_TOKENS, EMB_SIZE), jnp.float32)
    w_upd = jax.random.uniform(k_wu, (HIDDEN, fan_u), jnp.float32,
                               -bu_bound, bu_bound)
    b_upd = jax.random.uniform(k_bu, (HIDDEN,), jnp.float32,
                               -bu_bound, bu_bound)
    w_log = jax.random.uniform(k_wl, (NUM_TOKENS, HIDDEN), jnp.float32,
                               -bl_bound, bl_bound)
    b_log = jax.random.uniform(k_bl, (NUM_TOKENS,), jnp.float32,
                               -bl_bound, bl_bound)

    ids_seq = jax.random.randint(k_ids, (T, B), 0, NUM_TOKENS, jnp.int32)
    h0 = jax.random.normal(k_h, (B, HIDDEN), jnp.float32)

    lp_ref, h_ref = reference_sequence(ids_seq, h0, emb, w_upd, b_upd,
                                       w_log, b_log)

    # ------- f32 path (exact module numerics, tight tolerance) -------------
    params_f32 = prepare_params(emb, w_upd, b_upd, w_log, b_log,
                                compute_dtype=jnp.float32)
    logp_seq, h_final = char_rnn_sequence(ids_seq, h0, params_f32)
    jax.block_until_ready((logp_seq, h_final))
    assert jnp.allclose(h_final, h_ref, atol=1e-4), "final hidden mismatch (f32)"
    assert jnp.allclose(logp_seq, lp_ref, atol=1e-4), "log_softmax mismatch (f32)"

    # Single-cell API (exact module semantics: (h_next, log_probs)).
    h1, lp1 = char_rnn_cell(ids_seq[0], h0, params_f32)
    jax.block_until_ready((h1, lp1))
    h1_ref, lp1_ref = reference_cell(ids_seq[0], h0, emb, w_upd, b_upd,
                                     w_log, b_log)
    assert jnp.allclose(h1, h1_ref, atol=1e-5), "cell h_next mismatch"
    assert jnp.allclose(lp1, lp1_ref, atol=1e-5), "cell log_softmax mismatch"

    # ------- bf16 path (v6e/v7x MXU-friendly; f32 accumulation) ------------
    params_bf16 = prepare_params(emb, w_upd, b_upd, w_log, b_log,
                                 compute_dtype=jnp.bfloat16)
    logp_bf, h_bf = char_rnn_sequence(ids_seq, h0, params_bf16)
    jax.block_until_ready((logp_bf, h_bf))
    assert jnp.allclose(h_bf, h_ref, atol=3e-2, rtol=1e-2), \
        "final hidden mismatch (bf16)"
    assert jnp.allclose(logp_bf, lp_ref, atol=3e-2, rtol=1e-2), \
        "log_softmax mismatch (bf16)"

    print("KERNEL_OK")
</pallas_src>

<mosaic_0001>
module attributes {stable_mosaic.version = 11 : i64} {
  func.func @char_rnn_seq_kernel(%arg0: memref<8x8x128xf32, #tpu.memory_space<vmem>>, %arg1: memref<8x128xf32, #tpu.memory_space<vmem>>, %arg2: memref<128x128xf32, #tpu.memory_space<vmem>>, %arg3: memref<128x128xf32, #tpu.memory_space<vmem>>, %arg4: memref<1x128xf32, #tpu.memory_space<vmem>>, %arg5: memref<8x8x128xf32, #tpu.memory_space<vmem>>, %arg6: memref<8x128xf32, #tpu.memory_space<vmem>>) attributes {dimension_semantics = [], scalar_prefetch = 0 : i64, scratch_operands = 0 : i64, tpu.core_type = #tpu.core_type<tc>} {
    %c0 = arith.constant 0 : index
    %c0_0 = arith.constant 0 : index
    %0 = vector.load %arg2[%c0, %c0_0] : memref<128x128xf32, #tpu.memory_space<vmem>>, vector<128x128xf32>
    %c0_1 = arith.constant 0 : index
    %c0_2 = arith.constant 0 : index
    %1 = vector.load %arg3[%c0_1, %c0_2] : memref<128x128xf32, #tpu.memory_space<vmem>>, vector<128x128xf32>
    %c0_3 = arith.constant 0 : index
    %c0_4 = arith.constant 0 : index
    %2 = vector.load %arg4[%c0_3, %c0_4] : memref<1x128xf32, #tpu.memory_space<vmem>>, vector<1x128xf32>
    %3 = vector.shape_cast %2 : vector<1x128xf32> to vector<1x128xf32>
    %4 = vector.broadcast %3 : vector<1x128xf32> to vector<8x128xf32>
    %c0_5 = arith.constant 0 : index
    %c0_6 = arith.constant 0 : index
    %5 = vector.load %arg1[%c0_5, %c0_6] : memref<8x128xf32, #tpu.memory_space<vmem>>, vector<8x128xf32>
    %c0_i32 = arith.constant 0 : i32
    %cst = arith.constant dense<0.000000e+00> : vector<8x128xf32>
    %6 = tpu.matmul %5, %0, %cst {dimension_numbers = #tpu.dot_dimension_numbers<[1], [0], [0], [1], [0, 0, 1, 1], [], []>} : vector<8x128xf32>, vector<128x128xf32>, vector<8x128xf32> -> vector<8x128xf32>
    %7 = arith.index_cast %c0_i32 : i32 to index
    %c0_7 = arith.constant 0 : index
    %c0_8 = arith.constant 0 : index
    %8 = vector.load %arg0[%7, %c0_7, %c0_8] : memref<8x8x128xf32, #tpu.memory_space<vmem>>, vector<1x8x128xf32>
    %9 = vector.shape_cast %8 : vector<1x8x128xf32> to vector<8x128xf32>
    %10 = arith.addf %6, %9 : vector<8x128xf32>
    %11 = math.tanh %10 : vector<8x128xf32>
    %cst_9 = arith.constant dense<0.000000e+00> : vector<8x128xf32>
    %12 = tpu.matmul %11, %1, %cst_9 {dimension_numbers = #tpu.dot_dimension_numbers<[1], [0], [0], [1], [0, 0, 1, 1], [], []>} : vector<8x128xf32>, vector<128x128xf32>, vector<8x128xf32> -> vector<8x128xf32>
    %13 = arith.addf %12, %4 : vector<8x128xf32>
    %cst_10 = arith.constant dense<0xFF800000> : vector<8xf32>
    %14 = vector.multi_reduction <maximumf>, %13, %cst_10 [1] : vector<8x128xf32> to vector<8xf32>
    %15 = vector.shape_cast %14 : vector<8xf32> to vector<8x1xf32>
    %16 = vector.broadcast %15 : vector<8x1xf32> to vector<8x128xf32>
    %17 = arith.subf %13, %16 : vector<8x128xf32>
    %18 = math.exp %17 : vector<8x128xf32>
    %cst_11 = arith.constant dense<0.000000e+00> : vector<8xf32>
    %19 = vector.multi_reduction <add>, %18, %cst_11 [1] : vector<8x128xf32> to vector<8xf32>
    %20 = vector.shape_cast %19 : vector<8xf32> to vector<8x1xf32>
    %21 = math.log %20 : vector<8x1xf32>
    %22 = vector.broadcast %21 : vector<8x1xf32> to vector<8x128xf32>
    %23 = arith.subf %17, %22 : vector<8x128xf32>
    %24 = arith.index_cast %c0_i32 : i32 to index
    %c0_12 = arith.constant 0 : index
    %c0_13 = arith.constant 0 : index
    %25 = vector.load %arg5[%24, %c0_12, %c0_13] : memref<8x8x128xf32, #tpu.memory_space<vmem>>, vector<1x8x128xf32>
    %26 = vector.shape_cast %25 : vector<1x8x128xf32> to vector<8x128xf32>
    %27 = vector.shape_cast %23 : vector<8x128xf32> to vector<1x8x128xf32>
    tpu.vector_store %arg5[%24, %c0_12, %c0_13], %27 {strides = array<i32>} : memref<8x8x128xf32, #tpu.memory_space<vmem>>, vector<1x8x128xf32>,
    %c1_i32 = arith.constant 1 : i32
    %cst_14 = arith.constant dense<0.000000e+00> : vector<8x128xf32>
    %28 = tpu.matmul %11, %0, %cst_14 {dimension_numbers = #tpu.dot_dimension_numbers<[1], [0], [0], [1], [0, 0, 1, 1], [], []>} : vector<8x128xf32>, vector<128x128xf32>, vector<8x128xf32> -> vector<8x128xf32>
    %29 = arith.index_cast %c1_i32 : i32 to index
    %c0_15 = arith.constant 0 : index
    %c0_16 = arith.constant 0 : index
    %30 = vector.load %arg0[%29, %c0_15, %c0_16] : memref<8x8x128xf32, #tpu.memory_space<vmem>>, vector<1x8x128xf32>
    %31 = vector.shape_cast %30 : vector<1x8x128xf32> to vector<8x128xf32>
    %32 = arith.addf %28, %31 : vector<8x128xf32>
    %33 = math.tanh %32 : vector<8x128xf32>
    %cst_17 = arith.constant dense<0.000000e+00> : vector<8x128xf32>
    %34 = tpu.matmul %33, %1, %cst_17 {dimension_numbers = #tpu.dot_dimension_numbers<[1], [0], [0], [1], [0, 0, 1, 1], [], []>} : vector<8x128xf32>, vector<128x128xf32>, vector<8x128xf32> -> vector<8x128xf32>
    %35 = arith.addf %34, %4 : vector<8x128xf32>
    %cst_18 = arith.constant dense<0xFF800000> : vector<8xf32>
    %36 = vector.multi_reduction <maximumf>, %35, %cst_18 [1] : vector<8x128xf32> to vector<8xf32>
    %37 = vector.shape_cast %36 : vector<8xf32> to vector<8x1xf32>
    %38 = vector.broadcast %37 : vector<8x1xf32> to vector<8x128xf32>
    %39 = arith.subf %35, %38 : vector<8x128xf32>
    %40 = math.exp %39 : vector<8x128xf32>
    %cst_19 = arith.constant dense<0.000000e+00> : vector<8xf32>
    %41 = vector.multi_reduction <add>, %40, %cst_19 [1] : vector<8x128xf32> to vector<8xf32>
    %42 = vector.shape_cast %41 : vector<8xf32> to vector<8x1xf32>
    %43 = math.log %42 : vector<8x1xf32>
    %44 = vector.broadcast %43 : vector<8x1xf32> to vector<8x128xf32>
    %45 = arith.subf %39, %44 : vector<8x128xf32>
    %46 = arith.index_cast %c1_i32 : i32 to index
    %c0_20 = arith.constant 0 : index
    %c0_21 = arith.constant 0 : index
    %47 = vector.load %arg5[%46, %c0_20, %c0_21] : memref<8x8x128xf32, #tpu.memory_space<vmem>>, vector<1x8x128xf32>
    %48 = vector.shape_cast %47 : vector<1x8x128xf32> to vector<8x128xf32>
    %49 = vector.shape_cast %45 : vector<8x128xf32> to vector<1x8x128xf32>
    tpu.vector_store %arg5[%46, %c0_20, %c0_21], %49 {strides = array<i32>} : memref<8x8x128xf32, #tpu.memory_space<vmem>>, vector<1x8x128xf32>,
    %c2_i32 = arith.constant 2 : i32
    %cst_22 = arith.constant dense<0.000000e+00> : vector<8x128xf32>
    %50 = tpu.matmul %33, %0, %cst_22 {dimension_numbers = #tpu.dot_dimension_numbers<[1], [0], [0], [1], [0, 0, 1, 1], [], []>} : vector<8x128xf32>, vector<128x128xf32>, vector<8x128xf32> -> vector<8x128xf32>
    %51 = arith.index_cast %c2_i32 : i32 to index
    %c0_23 = arith.constant 0 : index
    %c0_24 = arith.constant 0 : index
    %52 = vector.load %arg0[%51, %c0_23, %c0_24] : memref<8x8x128xf32, #tpu.memory_space<vmem>>, vector<1x8x128xf32>
    %53 = vector.shape_cast %52 : vector<1x8x128xf32> to vector<8x128xf32>
    %54 = arith.addf %50, %53 : vector<8x128xf32>
    %55 = math.tanh %54 : vector<8x128xf32>
    %cst_25 = arith.constant dense<0.000000e+00> : vector<8x128xf32>
    %56 = tpu.matmul %55, %1, %cst_25 {dimension_numbers = #tpu.dot_dimension_numbers<[1], [0], [0], [1], [0, 0, 1, 1], [], []>} : vector<8x128xf32>, vector<128x128xf32>, vector<8x128xf32> -> vector<8x128xf32>
    %57 = arith.addf %56, %4 : vector<8x128xf32>
    %cst_26 = arith.constant dense<0xFF800000> : vector<8xf32>
    %58 = vector.multi_reduction <maximumf>, %57, %cst_26 [1] : vector<8x128xf32> to vector<8xf32>
    %59 = vector.shape_cast %58 : vector<8xf32> to vector<8x1xf32>
    %60 = vector.broadcast %59 : vector<8x1xf32> to vector<8x128xf32>
    %61 = arith.subf %57, %60 : vector<8x128xf32>
    %62 = math.exp %61 : vector<8x128xf32>
    %cst_27 = arith.constant dense<0.000000e+00> : vector<8xf32>
    %63 = vector.multi_reduction <add>, %62, %cst_27 [1] : vector<8x128xf32> to vector<8xf32>
    %64 = vector.shape_cast %63 : vector<8xf32> to vector<8x1xf32>
    %65 = math.log %64 : vector<8x1xf32>
    %66 = vector.broadcast %65 : vector<8x1xf32> to vector<8x128xf32>
    %67 = arith.subf %61, %66 : vector<8x128xf32>
    %68 = arith.index_cast %c2_i32 : i32 to index
    %c0_28 = arith.constant 0 : index
    %c0_29 = arith.constant 0 : index
    %69 = vector.load %arg5[%68, %c0_28, %c0_29] : memref<8x8x128xf32, #tpu.memory_space<vmem>>, vector<1x8x128xf32>
    %70 = vector.shape_cast %69 : vector<1x8x128xf32> to vector<8x128xf32>
    %71 = vector.shape_cast %67 : vector<8x128xf32> to vector<1x8x128xf32>
    tpu.vector_store %arg5[%68, %c0_28, %c0_29], %71 {strides = array<i32>} : memref<8x8x128xf32, #tpu.memory_space<vmem>>, vector<1x8x128xf32>,
    %c3_i32 = arith.constant 3 : i32
    %cst_30 = arith.constant dense<0.000000e+00> : vector<8x128xf32>
    %72 = tpu.matmul %55, %0, %cst_30 {dimension_numbers = #tpu.dot_dimension_numbers<[1], [0], [0], [1], [0, 0, 1, 1], [], []>} : vector<8x128xf32>, vector<128x128xf32>, vector<8x128xf32> -> vector<8x128xf32>
    %73 = arith.index_cast %c3_i32 : i32 to index
    %c0_31 = arith.constant 0 : index
    %c0_32 = arith.constant 0 : index
    %74 = vector.load %arg0[%73, %c0_31, %c0_32] : memref<8x8x128xf32, #tpu.memory_space<vmem>>, vector<1x8x128xf32>
    %75 = vector.shape_cast %74 : vector<1x8x128xf32> to vector<8x128xf32>
    %76 = arith.addf %72, %75 : vector<8x128xf32>
    %77 = math.tanh %76 : vector<8x128xf32>
    %cst_33 = arith.constant dense<0.000000e+00> : vector<8x128xf32>
    %78 = tpu.matmul %77, %1, %cst_33 {dimension_numbers = #tpu.dot_dimension_numbers<[1], [0], [0], [1], [0, 0, 1, 1], [], []>} : vector<8x128xf32>, vector<128x128xf32>, vector<8x128xf32> -> vector<8x128xf32>
    %79 = arith.addf %78, %4 : vector<8x128xf32>
    %cst_34 = arith.constant dense<0xFF800000> : vector<8xf32>
    %80 = vector.multi_reduction <maximumf>, %79, %cst_34 [1] : vector<8x128xf32> to vector<8xf32>
    %81 = vector.shape_cast %80 : vector<8xf32> to vector<8x1xf32>
    %82 = vector.broadcast %81 : vector<8x1xf32> to vector<8x128xf32>
    %83 = arith.subf %79, %82 : vector<8x128xf32>
    %84 = math.exp %83 : vector<8x128xf32>
    %cst_35 = arith.constant dense<0.000000e+00> : vector<8xf32>
    %85 = vector.multi_reduction <add>, %84, %cst_35 [1] : vector<8x128xf32> to vector<8xf32>
    %86 = vector.shape_cast %85 : vector<8xf32> to vector<8x1xf32>
    %87 = math.log %86 : vector<8x1xf32>
    %88 = vector.broadcast %87 : vector<8x1xf32> to vector<8x128xf32>
    %89 = arith.subf %83, %88 : vector<8x128xf32>
    %90 = arith.index_cast %c3_i32 : i32 to index
    %c0_36 = arith.constant 0 : index
    %c0_37 = arith.constant 0 : index
    %91 = vector.load %arg5[%90, %c0_36, %c0_37] : memref<8x8x128xf32, #tpu.memory_space<vmem>>, vector<1x8x128xf32>
    %92 = vector.shape_cast %91 : vector<1x8x128xf32> to vector<8x128xf32>
    %93 = vector.shape_cast %89 : vector<8x128xf32> to vector<1x8x128xf32>
    tpu.vector_store %arg5[%90, %c0_36, %c0_37], %93 {strides = array<i32>} : memref<8x8x128xf32, #tpu.memory_space<vmem>>, vector<1x8x128xf32>,
    %c4_i32 = arith.constant 4 : i32
    %cst_38 = arith.constant dense<0.000000e+00> : vector<8x128xf32>
    %94 = tpu.matmul %77, %0, %cst_38 {dimension_numbers = #tpu.dot_dimension_numbers<[1], [0], [0], [1], [0, 0, 1, 1], [], []>} : vector<8x128xf32>, vector<128x128xf32>, vector<8x128xf32> -> vector<8x128xf32>
    %95 = arith.index_cast %c4_i32 : i32 to index
    %c0_39 = arith.constant 0 : index
    %c0_40 = arith.constant 0 : index
    %96 = vector.load %arg0[%95, %c0_39, %c0_40] : memref<8x8x128xf32, #tpu.memory_space<vmem>>, vector<1x8x128xf32>
    %97 = vector.shape_cast %96 : vector<1x8x128xf32> to vector<8x128xf32>
    %98 = arith.addf %94, %97 : vector<8x128xf32>
    %99 = math.tanh %98 : vector<8x128xf32>
    %cst_41 = arith.constant dense<0.000000e+00> : vector<8x128xf32>
    %100 = tpu.matmul %99, %1, %cst_41 {dimension_numbers = #tpu.dot_dimension_numbers<[1], [0], [0], [1], [0, 0, 1, 1], [], []>} : vector<8x128xf32>, vector<128x128xf32>, vector<8x128xf32> -> vector<8x128xf32>
    %101 = arith.addf %100, %4 : vector<8x128xf32>
    %cst_42 = arith.constant dense<0xFF800000> : vector<8xf32>
    %102 = vector.multi_reduction <maximumf>, %101, %cst_42 [1] : vector<8x128xf32> to vector<8xf32>
    %103 = vector.shape_cast %102 : vector<8xf32> to vector<8x1xf32>
    %104 = vector.broadcast %103 : vector<8x1xf32> to vector<8x128xf32>
    %105 = arith.subf %101, %104 : vector<8x128xf32>
    %106 = math.exp %105 : vector<8x128xf32>
    %cst_43 = arith.constant dense<0.000000e+00> : vector<8xf32>
    %107 = vector.multi_reduction <add>, %106, %cst_43 [1] : vector<8x128xf32> to vector<8xf32>
    %108 = vector.shape_cast %107 : vector<8xf32> to vector<8x1xf32>
    %109 = math.log %108 : vector<8x1xf32>
    %110 = vector.broadcast %109 : vector<8x1xf32> to vector<8x128xf32>
    %111 = arith.subf %105, %110 : vector<8x128xf32>
    %112 = arith.index_cast %c4_i32 : i32 to index
    %c0_44 = arith.constant 0 : index
    %c0_45 = arith.constant 0 : index
    %113 = vector.load %arg5[%112, %c0_44, %c0_45] : memref<8x8x128xf32, #tpu.memory_space<vmem>>, vector<1x8x128xf32>
    %114 = vector.shape_cast %113 : vector<1x8x128xf32> to vector<8x128xf32>
    %115 = vector.shape_cast %111 : vector<8x128xf32> to vector<1x8x128xf32>
    tpu.vector_store %arg5[%112, %c0_44, %c0_45], %115 {strides = array<i32>} : memref<8x8x128xf32, #tpu.memory_space<vmem>>, vector<1x8x128xf32>,
    %c5_i32 = arith.constant 5 : i32
    %cst_46 = arith.constant dense<0.000000e+00> : vector<8x128xf32>
    %116 = tpu.matmul %99, %0, %cst_46 {dimension_numbers = #tpu.dot_dimension_numbers<[1], [0], [0], [1], [0, 0, 1, 1], [], []>} : vector<8x128xf32>, vector<128x128xf32>, vector<8x128xf32> -> vector<8x128xf32>
    %117 = arith.index_cast %c5_i32 : i32 to index
    %c0_47 = arith.constant 0 : index
    %c0_48 = arith.constant 0 : index
    %118 = vector.load %arg0[%117, %c0_47, %c0_48] : memref<8x8x128xf32, #tpu.memory_space<vmem>>, vector<1x8x128xf32>
    %119 = vector.shape_cast %118 : vector<1x8x128xf32> to vector<8x128xf32>
    %120 = arith.addf %116, %119 : vector<8x128xf32>
    %121 = math.tanh %120 : vector<8x128xf32>
    %cst_49 = arith.constant dense<0.000000e+00> : vector<8x128xf32>
    %122 = tpu.matmul %121, %1, %cst_49 {dimension_numbers = #tpu.dot_dimension_numbers<[1], [0], [0], [1], [0, 0, 1, 1], [], []>} : vector<8x128xf32>, vector<128x128xf32>, vector<8x128xf32> -> vector<8x128xf32>
    %123 = arith.addf %122, %4 : vector<8x128xf32>
    %cst_50 = arith.constant dense<0xFF800000> : vector<8xf32>
    %124 = vector.multi_reduction <maximumf>, %123, %cst_50 [1] : vector<8x128xf32> to vector<8xf32>
    %125 = vector.shape_cast %124 : vector<8xf32> to vector<8x1xf32>
    %126 = vector.broadcast %125 : vector<8x1xf32> to vector<8x128xf32>
    %127 = arith.subf %123, %126 : vector<8x128xf32>
    %128 = math.exp %127 : vector<8x128xf32>
    %cst_51 = arith.constant dense<0.000000e+00> : vector<8xf32>
    %129 = vector.multi_reduction <add>, %128, %cst_51 [1] : vector<8x128xf32> to vector<8xf32>
    %130 = vector.shape_cast %129 : vector<8xf32> to vector<8x1xf32>
    %131 = math.log %130 : vector<8x1xf32>
    %132 = vector.broadcast %131 : vector<8x1xf32> to vector<8x128xf32>
    %133 = arith.subf %127, %132 : vector<8x128xf32>
    %134 = arith.index_cast %c5_i32 : i32 to index
    %c0_52 = arith.constant 0 : index
    %c0_53 = arith.constant 0 : index
    %135 = vector.load %arg5[%134, %c0_52, %c0_53] : memref<8x8x128xf32, #tpu.memory_space<vmem>>, vector<1x8x128xf32>
    %136 = vector.shape_cast %135 : vector<1x8x128xf32> to vector<8x128xf32>
    %137 = vector.shape_cast %133 : vector<8x128xf32> to vector<1x8x128xf32>
    tpu.vector_store %arg5[%134, %c0_52, %c0_53], %137 {strides = array<i32>} : memref<8x8x128xf32, #tpu.memory_space<vmem>>, vector<1x8x128xf32>,
    %c6_i32 = arith.constant 6 : i32
    %cst_54 = arith.constant dense<0.000000e+00> : vector<8x128xf32>
    %138 = tpu.matmul %121, %0, %cst_54 {dimension_numbers = #tpu.dot_dimension_numbers<[1], [0], [0], [1], [0, 0, 1, 1], [], []>} : vector<8x128xf32>, vector<128x128xf32>, vector<8x128xf32> -> vector<8x128xf32>
    %139 = arith.index_cast %c6_i32 : i32 to index
    %c0_55 = arith.constant 0 : index
    %c0_56 = arith.constant 0 : index
    %140 = vector.load %arg0[%139, %c0_55, %c0_56] : memref<8x8x128xf32, #tpu.memory_space<vmem>>, vector<1x8x128xf32>
    %141 = vector.shape_cast %140 : vector<1x8x128xf32> to vector<8x128xf32>
    %142 = arith.addf %138, %141 : vector<8x128xf32>
    %143 = math.tanh %142 : vector<8x128xf32>
    %cst_57 = arith.constant dense<0.000000e+00> : vector<8x128xf32>
    %144 = tpu.matmul %143, %1, %cst_57 {dimension_numbers = #tpu.dot_dimension_numbers<[1], [0], [0], [1], [0, 0, 1, 1], [], []>} : vector<8x128xf32>, vector<128x128xf32>, vector<8x128xf32> -> vector<8x128xf32>
    %145 = arith.addf %144, %4 : vector<8x128xf32>
    %cst_58 = arith.constant dense<0xFF800000> : vector<8xf32>
    %146 = vector.multi_reduction <maximumf>, %145, %cst_58 [1] : vector<8x128xf32> to vector<8xf32>
    %147 = vector.shape_cast %146 : vector<8xf32> to vector<8x1xf32>
    %148 = vector.broadcast %147 : vector<8x1xf32> to vector<8x128xf32>
    %149 = arith.subf %145, %148 : vector<8x128xf32>
    %150 = math.exp %149 : vector<8x128xf32>
    %cst_59 = arith.constant dense<0.000000e+00> : vector<8xf32>
    %151 = vector.multi_reduction <add>, %150, %cst_59 [1] : vector<8x128xf32> to vector<8xf32>
    %152 = vector.shape_cast %151 : vector<8xf32> to vector<8x1xf32>
    %153 = math.log %152 : vector<8x1xf32>
    %154 = vector.broadcast %153 : vector<8x1xf32> to vector<8x128xf32>
    %155 = arith.subf %149, %154 : vector<8x128xf32>
    %156 = arith.index_cast %c6_i32 : i32 to index
    %c0_60 = arith.constant 0 : index
    %c0_61 = arith.constant 0 : index
    %157 = vector.load %arg5[%156, %c0_60, %c0_61] : memref<8x8x128xf32, #tpu.memory_space<vmem>>, vector<1x8x128xf32>
    %158 = vector.shape_cast %157 : vector<1x8x128xf32> to vector<8x128xf32>
    %159 = vector.shape_cast %155 : vector<8x128xf32> to vector<1x8x128xf32>
    tpu.vector_store %arg5[%156, %c0_60, %c0_61], %159 {strides = array<i32>} : memref<8x8x128xf32, #tpu.memory_space<vmem>>, vector<1x8x128xf32>,
    %c7_i32 = arith.constant 7 : i32
    %cst_62 = arith.constant dense<0.000000e+00> : vector<8x128xf32>
    %160 = tpu.matmul %143, %0, %cst_62 {dimension_numbers = #tpu.dot_dimension_numbers<[1], [0], [0], [1], [0, 0, 1, 1], [], []>} : vector<8x128xf32>, vector<128x128xf32>, vector<8x128xf32> -> vector<8x128xf32>
    %161 = arith.index_cast %c7_i32 : i32 to index
    %c0_63 = arith.constant 0 : index
    %c0_64 = arith.constant 0 : index
    %162 = vector.load %arg0[%161, %c0_63, %c0_64] : memref<8x8x128xf32, #tpu.memory_space<vmem>>, vector<1x8x128xf32>
    %163 = vector.shape_cast %162 : vector<1x8x128xf32> to vector<8x128xf32>
    %164 = arith.addf %160, %163 : vector<8x128xf32>
    %165 = math.tanh %164 : vector<8x128xf32>
    %cst_65 = arith.constant dense<0.000000e+00> : vector<8x128xf32>
    %166 = tpu.matmul %165, %1, %cst_65 {dimension_numbers = #tpu.dot_dimension_numbers<[1], [0], [0], [1], [0, 0, 1, 1], [], []>} : vector<8x128xf32>, vector<128x128xf32>, vector<8x128xf32> -> vector<8x128xf32>
    %167 = arith.addf %166, %4 : vector<8x128xf32>
    %cst_66 = arith.constant dense<0xFF800000> : vector<8xf32>
    %168 = vector.multi_reduction <maximumf>, %167, %cst_66 [1] : vector<8x128xf32> to vector<8xf32>
    %169 = vector.shape_cast %168 : vector<8xf32> to vector<8x1xf32>
    %170 = vector.broadcast %169 : vector<8x1xf32> to vector<8x128xf32>
    %171 = arith.subf %167, %170 : vector<8x128xf32>
    %172 = math.exp %171 : vector<8x128xf32>
    %cst_67 = arith.constant dense<0.000000e+00> : vector<8xf32>
    %173 = vector.multi_reduction <add>, %172, %cst_67 [1] : vector<8x128xf32> to vector<8xf32>
    %174 = vector.shape_cast %173 : vector<8xf32> to vector<8x1xf32>
    %175 = math.log %174 : vector<8x1xf32>
    %176 = vector.broadcast %175 : vector<8x1xf32> to vector<8x128xf32>
    %177 = arith.subf %171, %176 : vector<8x128xf32>
    %178 = arith.index_cast %c7_i32 : i32 to index
    %c0_68 = arith.constant 0 : index
    %c0_69 = arith.constant 0 : index
    %179 = vector.load %arg5[%178, %c0_68, %c0_69] : memref<8x8x128xf32, #tpu.memory_space<vmem>>, vector<1x8x128xf32>
    %180 = vector.shape_cast %179 : vector<1x8x128xf32> to vector<8x128xf32>
    %181 = vector.shape_cast %177 : vector<8x128xf32> to vector<1x8x128xf32>
    tpu.vector_store %arg5[%178, %c0_68, %c0_69], %181 {strides = array<i32>} : memref<8x8x128xf32, #tpu.memory_space<vmem>>, vector<1x8x128xf32>,
    %c8_i32 = arith.constant 8 : i32
    %c0_70 = arith.constant 0 : index
    %c0_71 = arith.constant 0 : index
    %182 = vector.load %arg6[%c0_70, %c0_71] : memref<8x128xf32, #tpu.memory_space<vmem>>, vector<8x128xf32>
    tpu.vector_store %arg6[%c0_70, %c0_71], %165 {strides = array<i32>} : memref<8x128xf32, #tpu.memory_space<vmem>>, vector<8x128xf32>,
    return
  }
}

</mosaic_0001>

<bundles_post_ra>
// kernel: tpu_custom_call.1
= control target key start
LH: loop header
LB: loop body
LE: loop exit
PB: predicated region body
PF: predicated region fallthrough
CT: control target
= control target key end

     0   :  { %12 = vsyncpa [#allocation3], 0  ;;  %s3308_s0 = inlined_call_operand.hbm [shape: f32[8,8,128], index: 0, kind: input, shape index: {}]   ;;  %s3309_s1 = inlined_call_operand.hbm [shape: f32[8,128], index: 1, kind: input, shape index: {}]   ;;  %s3310_s2 = inlined_call_operand.hbm [shape: f32[128,128], index: 2, kind: input, shape index: {}]   ;;  %s3311_s3 = inlined_call_operand.hbm [shape: f32[128,128], index: 3, kind: input, shape index: {}]   ;;  %s3312_s4 = inlined_call_operand.vmem [shape: f32[1,128], index: 4, kind: input, shape index: {}]   ;;  %s3313_s5 = inlined_call_operand.hbm [shape: f32[8,8,128], index: 5, kind: output, shape index: {0}]   ;;  %s3314_s6 = inlined_call_operand.hbm [shape: f32[8,128], index: 6, kind: output, shape index: {1}]  }
   0x1   :  { %13 = vsyncpa [#allocation6], 0 }
   0x2   :  { %14 = vsyncpa [#allocation9], 0 }
   0x3   :  { %15 = vsyncpa [#allocation4], 0 }
   0x4   :  { %16 = vsyncpa [#allocation12], 0  ;;  %s2807_s21 = smov [#allocation5]   ;;  %s2808_s23 = smov [#allocation2]  }
   0x5   :  { %s35_s22 = sshll.u32 %s2807_s21, 4  ;;  %s22_s24 = sshll.u32 %s2808_s23, 4  ;;  %s36_s22 = int_to_ptr.vmem [resolvable:$true] %s35_s22  ;;  %s2853_s24 = int_to_ptr.vmem [resolvable:$true] %s22_s24 }
   0x6   :  { %s2665_s27 = scalar_lea.hbm %s3309_s1, 128 }
   0x7   :  { %p2666_p0 = scmp.ne.s32.totalorder %s3309_s1, %s2665_s27  ;;  %p2669_p1 = scmp.lt.u32.totalorder %s2665_s27, %s3309_s1 }
   0x9   :  { %p2671_p2 = pnand %p2669_p1, %p2666_p0 }
   0xb   :  { %2674 = shalt.err (!%p2671_p2)
}
   0xc   :  { %s2675_s8 = scalar_lea.vmem %s36_s22, 128  ;;  %p2680_p4 = scmp.lt.s32.totalorder %s36_s22, %s36_s22 }
   0xd   :  { %p2676_p3 = scmp.ne.s32.totalorder %s36_s22, %s2675_s8  ;;  %p2681_p5 = scmp.lt.s32.totalorder %s2675_s8, %s2675_s8 }
   0xf   :  { %p2682_p6 = por %p2681_p5, %p2680_p4 }
  0x11   :  { %p2683_p7 = pnand %p2682_p6, %p2676_p3 }
  0x13   :  { %2686 = shalt.err (!%p2683_p7)
}
  0x14   :  { %38 = dma.hbm_to_vmem [thread:$0]  %s3309_s1, 128, %s36_s22, [#allocation6]  }
  0x15   :  { %s2687_s13 = scalar_lea.hbm %s3308_s0, 1024 }
  0x16   :  { %p2688_p8 = scmp.ne.s32.totalorder %s3308_s0, %s2687_s13  ;;  %p2691_p9 = scmp.lt.u32.totalorder %s2687_s13, %s3308_s0 }
  0x18   :  { %p2693_p10 = pnand %p2691_p9, %p2688_p8 }
  0x1a   :  { %2696 = shalt.err (!%p2693_p10)
}
  0x1b   :  { %s2697_s18 = scalar_lea.vmem %s2853_s24, 1024  ;;  %p2702_p12 = scmp.lt.s32.totalorder %s2853_s24, %s2853_s24 }
  0x1c   :  { %p2698_p11 = scmp.ne.s32.totalorder %s2853_s24, %s2697_s18  ;;  %p2703_p13 = scmp.lt.s32.totalorder %s2697_s18, %s2697_s18 }
  0x1e   :  { %p2704_p0 = por %p2703_p13, %p2702_p12 }
  0x20   :  { %p2705_p1 = pnand %p2704_p0, %p2698_p11 }
  0x22   :  { %2708 = shalt.err (!%p2705_p1)
}
  0x23   :  { %s2809_s1 = smov 128   ;;  %s2810_s19 = smov 8  }
  0x24   :  { %28 = dma.hbm_to_vmem [thread:$0]  %s3308_s0, 1024, %s2853_s24, [#allocation3], %s2809_s1, %s2809_s1, %s2810_s19  }
  0x25   :  { %s2811_s22 = smov [#allocation7]   ;;  %s2812_s25 = smov [#allocation8]  }
  0x26   :  { %s44_s23 = sshll.u32 %s2811_s22, 4  ;;  %s56_s26 = sshll.u32 %s2812_s25, 4  ;;  %s45_s23 = int_to_ptr.vmem [resolvable:$true] %s44_s23  ;;  %s2887_s26 = int_to_ptr.vmem [resolvable:$true] %s56_s26 }
  0x27   :  { %s2709_s29 = scalar_lea.hbm %s3310_s2, 2048 }
  0x28   :  { %p2710_p2 = scmp.ne.s32.totalorder %s3310_s2, %s2709_s29  ;;  %p2713_p3 = scmp.lt.u32.totalorder %s2709_s29, %s3310_s2 }
  0x2a   :  { %p2715_p4 = pnand %p2713_p3, %p2710_p2 }
  0x2c   :  { %2718 = shalt.err (!%p2715_p4)
}
  0x2d   :  { %s2719_s0 = scalar_lea.vmem %s45_s23, 2048  ;;  %p2724_p6 = scmp.lt.s32.totalorder %s45_s23, %s45_s23 }
  0x2e   :  { %p2720_p5 = scmp.ne.s32.totalorder %s45_s23, %s2719_s0  ;;  %p2725_p7 = scmp.lt.s32.totalorder %s2719_s0, %s2719_s0 }
  0x30   :  { %p2726_p8 = por %p2725_p7, %p2724_p6 }
  0x32   :  { %p2727_p9 = pnand %p2726_p8, %p2720_p5 }
  0x34   :  { %2730 = shalt.err (!%p2727_p9)
}
  0x35   :  { %50 = dma.hbm_to_vmem [thread:$0]  %s3310_s2, 2048, %s45_s23, [#allocation6], %s2809_s1, %s2809_s1, %s2810_s19  }
  0x36   :  { %s2731_s13 = scalar_lea.hbm %s3311_s3, 2048 }
  0x37   :  { %p2732_p10 = scmp.ne.s32.totalorder %s3311_s3, %s2731_s13  ;;  %p2735_p11 = scmp.lt.u32.totalorder %s2731_s13, %s3311_s3 }
  0x39   :  { %p2737_p12 = pnand %p2735_p11, %p2732_p10 }
  0x3b   :  { %2740 = shalt.err (!%p2737_p12)
}
  0x3c   :  { %s2741_s18 = scalar_lea.vmem %s2887_s26, 2048  ;;  %p2746_p0 = scmp.lt.s32.totalorder %s2887_s26, %s2887_s26 }
  0x3d   :  { %p2742_p13 = scmp.ne.s32.totalorder %s2887_s26, %s2741_s18  ;;  %p2747_p1 = scmp.lt.s32.totalorder %s2741_s18, %s2741_s18 }
  0x3f   :  { %p2748_p2 = por %p2747_p1, %p2746_p0 }
  0x41   :  { %p2749_p3 = pnand %p2748_p2, %p2742_p13 }
  0x43   :  { %2752 = shalt.err (!%p2749_p3)
}
  0x44   :  { %62 = dma.hbm_to_vmem [thread:$0]  %s3311_s3, 2048, %s2887_s26, [#allocation9], %s2809_s1, %s2809_s1, %s2810_s19  }
  0x45   :  { %2797 = dma.done.wait [#allocation3], 1024  }
  0x46   :  { %2798 = vsyncadd [#allocation3], 4294966272 }
  0x47   :  { %2799 = dma.done.wait [#allocation6], 2176  }
  0x48   :  { %2800 = vsyncadd [#allocation6], 4294965120 }
  0x49   :  { %2801 = dma.done.wait [#allocation9], 2048  }
  0x4a   :  { %2802 = vsyncadd [#allocation9], 4294965248  ;;  %v2813_v0 = vmov 0.0|0.0   ;;  %vm2814_vm0 = vmmov 0   ;;  %v2815_v1 = vmov 0.0   ;;  %v77_v2 = vld [vmem:[#allocation7] sm:$0xff] }
  0x4b   :  { %2222 = vmatprep.subr.bf16.mxu0 %v2813_v0  ;;  %1694 = vmatprep.mubr.msk.f32.mxu0 %vm2814_vm0, %v2815_v1  ;;  %v78_v3 = vld [vmem:[#allocation7 + $0x8] sm:$0xff]  ;;  %v79_v4 = vld [vmem:[#allocation7 + $0x10] sm:$0xff]  ;;  %v80_v6 = vld [vmem:[#allocation7 + $0x18] sm:$0xff] }
  0x4c   :  { %2246 = vmatprep.subr.bf16.mxu1 %v2813_v0  ;;  %1729 = vmatprep.mubr.msk.f32.mxu1 %vm2814_vm0, %v2815_v1  ;;  %v2930_v5 = vpack.c.bf16 %v78_v3, %v77_v2  ;;  %v2933_v7 = vpack.c.bf16 %v80_v6, %v79_v4  ;;  %v81_v8 = vld [vmem:[#allocation7 + $0x20] sm:$0xff]  ;;  %v82_v9 = vld [vmem:[#allocation7 + $0x28] sm:$0xff]  ;;  %v95_v12 = vld [vmem:[#allocation8 + $0x10] sm:$0xff] }
  0x4d   :  { %v93_v10 = vld [vmem:[#allocation8] sm:$0xff]  ;;  %v94_v11 = vld [vmem:[#allocation8 + $0x8] sm:$0xff]  ;;  %v96_v13 = vld [vmem:[#allocation8 + $0x18] sm:$0xff]  ;;  %v2937_v14 = vpack.c.bf16 %v82_v9, %v81_v8 }
  0x4e   :  { %2224 = vmatpush3.bf16.msra.mxu0 %v2930_v5  ;;  %v2939_v15 = vpack.c.bf16 %v94_v11, %v93_v10  ;;  %v83_v16 = vld [vmem:[#allocation7 + $0x30] sm:$0xff]  ;;  %v84_v17 = vld [vmem:[#allocation7 + $0x38] sm:$0xff]  ;;  %v2943_v18 = vpack.c.bf16 %v96_v13, %v95_v12  ;;  %v97_v19 = vld [vmem:[#allocation8 + $0x20] sm:$0xff] }
  0x4f   :  { %2225 = vmatprep.subr.bf16.mxu0 %v2813_v0  ;;  %v98_v20 = vld [vmem:[#allocation8 + $0x28] sm:$0xff]  ;;  %v2947_v21 = vpack.c.bf16 %v84_v17, %v83_v16  ;;  %v85_v22 = vld [vmem:[#allocation7 + $0x40] sm:$0xff]  ;;  %v99_v25 = vld [vmem:[#allocation8 + $0x30] sm:$0xff] }
  0x50   :  { %2248 = vmatpush3.bf16.msra.mxu1 %v2939_v15  ;;  %v86_v23 = vld [vmem:[#allocation7 + $0x48] sm:$0xff]  ;;  %v2951_v24 = vpack.c.bf16 %v98_v20, %v97_v19  ;;  %v100_v26 = vld [vmem:[#allocation8 + $0x38] sm:$0xff]  ;;  %v87_v28 = vld [vmem:[#allocation7 + $0x50] sm:$0xff] }
  0x51   :  { %2249 = vmatprep.subr.bf16.mxu1 %v2813_v0  ;;  %v2955_v27 = vpack.c.bf16 %v86_v23, %v85_v22  ;;  %v88_v29 = vld [vmem:[#allocation7 + $0x58] sm:$0xff]  ;;  %v2959_v30 = vpack.c.bf16 %v100_v26, %v99_v25  ;;  %v101_v31 = vld [vmem:[#allocation8 + $0x40] sm:$0xff]  ;;  %v102_v32 = vld [vmem:[#allocation8 + $0x48] sm:$0xff] }
  0x52   :  { %2227 = vmatpush3.bf16.msra.mxu0 %v2933_v7  ;;  %v2963_v33 = vpack.c.bf16 %v88_v29, %v87_v28  ;;  %v89_v34 = vld [vmem:[#allocation7 + $0x60] sm:$0xff]  ;;  %v90_v35 = vld [vmem:[#allocation7 + $0x68] sm:$0xff]  ;;  %v2967_v36 = vpack.c.bf16 %v102_v32, %v101_v31  ;;  %v91_v38 = vld [vmem:[#allocation7 + $0x70] sm:$0xff] }
  0x53   :  { %2228 = vmatprep.subr.bf16.mxu0 %v2813_v0  ;;  %v2971_v37 = vpack.c.bf16 %v90_v35, %v89_v34  ;;  %v92_v39 = vld [vmem:[#allocation7 + $0x78] sm:$0xff]  ;;  %v103_v42 = vld [vmem:[#allocation8 + $0x50] sm:$0xff]  ;;  %v105_v45 = vld [vmem:[#allocation8 + $0x60] sm:$0xff] }
  0x54   :  { %2251 = vmatpush3.bf16.msra.mxu1 %v2943_v18  ;;  %v2977_v40 = vpack.c.bf16 %v92_v39, %v91_v38  ;;  %v116_v41 = vld [vmem:[#allocation5] sm:$0xff]  ;;  %v106_v46 = vld [vmem:[#allocation8 + $0x68] sm:$0xff]  ;;  %v107_v48 = vld [vmem:[#allocation8 + $0x70] sm:$0xff] }
  0x55   :  { %2252 = vmatprep.subr.bf16.mxu1 %v2813_v0  ;;  %v104_v43 = vld [vmem:[#allocation8 + $0x58] sm:$0xff]  ;;  %v3004_v47 = vpack.c.bf16 %v106_v46, %v105_v45  ;;  %v271_v57 = vld [vmem:[#allocation2 + $0x8] sm:$0xff]  ;;  %v426_v3 = vld [vmem:[#allocation2 + $0x10] sm:$0xff] }
  0x56   :  { %2230 = vmatpush3.bf16.msra.mxu0 %v2937_v14  ;;  %v3000_v44 = vpack.c.bf16 %v104_v43, %v103_v42  ;;  %v108_v49 = vld [vmem:[#allocation8 + $0x78] sm:$0xff]  ;;  %v581_v13 = vld [vmem:[#allocation2 + $0x18] sm:$0xff]  ;;  %v891_v39 = vld [vmem:[#allocation2 + $0x28] sm:$0xff] }
  0x57   :  { %2231 = vmatprep.subr.bf16.mxu0 %v2813_v0  ;;  %v3007_v50 = vpack.c.bf16 %v108_v49, %v107_v48  ;;  %v117_v51 = vld [vmem:[#allocation2] sm:$0xff] }
  0x58   :  { %2254 = vmatpush3.bf16.msra.mxu1 %v2951_v24  ;;  %v3051_v56 = vld [vmem:[%s3312_s4] ss:$0 sm:$0xff]  ;;  %s2816_s4 = smov [#allocation11]  }
  0x59   :  { %2255 = vmatprep.subr.bf16.mxu1 %v2813_v0  ;;  %v736_v26 = vld [vmem:[#allocation2 + $0x20] sm:$0xff]  ;;  %s1374_s22 = sshll.u32 %s2816_s4, 4  ;;  %s1375_s22 = int_to_ptr.vmem [resolvable:$true] %s1374_s22 }
  0x5a   :  { %2233 = vmatpush3.bf16.msra.mxu0 %v2947_v21  ;;  %s2753_s23 = scalar_lea.vmem %s1375_s22, 128  ;;  %p2758_p5 = scmp.lt.s32.totalorder %s1375_s22, %s1375_s22 }
  0x5b   :  { %2234 = vmatprep.subr.bf16.mxu0 %v2813_v0  ;;  %p2754_p4 = scmp.ne.s32.totalorder %s1375_s22, %s2753_s23  ;;  %p2759_p6 = scmp.lt.s32.totalorder %s2753_s23, %s2753_s23 }
  0x5c   :  { %2257 = vmatpush3.bf16.msra.mxu1 %v2959_v30 }
  0x5d   :  { %2258 = vmatprep.subr.bf16.mxu1 %v2813_v0  ;;  %p2760_p7 = por %p2759_p6, %p2758_p5 }
  0x5e   :  { %2236 = vmatpush3.bf16.msra.mxu0 %v2955_v27 }
  0x5f   :  { %2237 = vmatprep.subr.bf16.mxu0 %v2813_v0  ;;  %p2761_p8 = pnand %p2760_p7, %p2754_p4 }
  0x60   :  { %2260 = vmatpush3.bf16.msra.mxu1 %v2967_v36 }
  0x61   :  { %2261 = vmatprep.subr.bf16.mxu1 %v2813_v0 }
  0x62   :  { %2239 = vmatpush3.bf16.msra.mxu0 %v2963_v33 }
  0x63   :  { %2240 = vmatprep.subr.bf16.mxu0 %v2813_v0 }
  0x64   :  { %2263 = vmatpush3.bf16.msra.mxu1 %v3000_v44 }
  0x65   :  { %2264 = vmatprep.subr.bf16.mxu1 %v2813_v0 }
  0x66   :  { %2242 = vmatpush3.bf16.msra.mxu0 %v2971_v37 }
  0x67   :  { %2243 = vmatprep.subr.bf16.mxu0 %v2813_v0 }
  0x68   :  { %2266 = vmatpush3.bf16.msra.mxu1 %v3004_v47 }
  0x69   :  { %2267 = vmatprep.subr.bf16.mxu1 %v2813_v0 }
  0x6a   :  { %2245 = vmatpush3.bf16.msra.mxu0 %v2977_v40 }
  0x6b   :  { %2270 = vmatprep.subr.bf16.mxu0 %v2813_v0 }
  0x6c   :  { %2269 = vmatpush3.bf16.msra.mxu1 %v3007_v50 }
  0x6d   :  { %1695 = vmatmul.mubr.f32.vlgmr.msra.gmra.mrb[0].mxu0 %v116_v41  ;;  %2294 = vmatprep.subr.bf16.mxu1 %v2813_v0 }
  0x6e   :  { %2272 = vmatpush3.bf16.msra.mxu0 %v2930_v5  ;;  %1764 = vmatprep.mubr.msk.f32.mxu0 %vm2814_vm0, %v2815_v1 }
  0x6f   :  { %2273 = vmatprep.subr.bf16.mxu0 %v2813_v0 }
  0x72   :  { %2275 = vmatpush3.bf16.msra.mxu0 %v2933_v7 }
  0x73   :  { %2276 = vmatprep.subr.bf16.mxu0 %v2813_v0 }
  0x76   :  { %2278 = vmatpush3.bf16.msra.mxu0 %v2937_v14 }
  0x77   :  { %2279 = vmatprep.subr.bf16.mxu0 %v2813_v0 }
  0x7a   :  { %2281 = vmatpush3.bf16.msra.mxu0 %v2947_v21 }
  0x7b   :  { %2282 = vmatprep.subr.bf16.mxu0 %v2813_v0 }
  0x7e   :  { %2284 = vmatpush3.bf16.msra.mxu0 %v2955_v27 }
  0x7f   :  { %2285 = vmatprep.subr.bf16.mxu0 %v2813_v0 }
  0x82   :  { %2287 = vmatpush3.bf16.msra.mxu0 %v2963_v33 }
  0x83   :  { %2288 = vmatprep.subr.bf16.mxu0 %v2813_v0 }
  0x86   :  { %2290 = vmatpush3.bf16.msra.mxu0 %v2971_v37 }
  0x87   :  { %2291 = vmatprep.subr.bf16.mxu0 %v2813_v0 }
  0x8a   :  { %2293 = vmatpush3.bf16.msra.mxu0 %v2977_v40 }
  0x8b   :  { %2318 = vmatprep.subr.bf16.mxu0 %v2813_v0 }
 0x140   :  { %v184_v52 = vpop.f32.mrb[0].mxu0 }
 0x141   :  { %v185_v53 = vadd.f32 %v184_v52, %v117_v51  ;;  %v1696_v54 = vpop.f32.mrb[1].mxu0 }
 0x143   :  { %2617 = vtanh.f32 %v185_v53  ;;  %v1201_v53 = vld [vmem:[#allocation2 + $0x38] sm:$0xff] }
 0x14d   :  { %v2618_v55 = vpop.eup %2617 }
 0x14e   :  { %1730 = vmatmul.mubr.f32.vlgmr.msra.gmra.mrb[0].mxu1 %v2618_v55  ;;  %1765 = vmatmul.mubr.f32.vlgmr.msra.gmra.mrb[2].mxu0 %v2618_v55 }
 0x14f   :  { %2296 = vmatpush3.bf16.msra.mxu1 %v2939_v15  ;;  %2320 = vmatpush3.bf16.msra.mxu0 %v2930_v5 }
 0x150   :  { %2297 = vmatprep.subr.bf16.mxu1 %v2813_v0  ;;  %2321 = vmatprep.subr.bf16.mxu0 %v2813_v0 }
 0x151   :  { %1799 = vmatprep.mubr.msk.f32.mxu1 %vm2814_vm0, %v2815_v1  ;;  %1834 = vmatprep.mubr.msk.f32.mxu0 %vm2814_vm0, %v2815_v1 }
 0x153   :  { %2299 = vmatpush3.bf16.msra.mxu1 %v2943_v18  ;;  %2323 = vmatpush3.bf16.msra.mxu0 %v2933_v7 }
 0x154   :  { %2300 = vmatprep.subr.bf16.mxu1 %v2813_v0  ;;  %2324 = vmatprep.subr.bf16.mxu0 %v2813_v0 }
 0x157   :  { %2302 = vmatpush3.bf16.msra.mxu1 %v2951_v24  ;;  %2326 = vmatpush3.bf16.msra.mxu0 %v2937_v14 }
 0x158   :  { %2303 = vmatprep.subr.bf16.mxu1 %v2813_v0  ;;  %2327 = vmatprep.subr.bf16.mxu0 %v2813_v0 }
 0x15b   :  { %2305 = vmatpush3.bf16.msra.mxu1 %v2959_v30  ;;  %2329 = vmatpush3.bf16.msra.mxu0 %v2947_v21 }
 0x15c   :  { %2306 = vmatprep.subr.bf16.mxu1 %v2813_v0  ;;  %2330 = vmatprep.subr.bf16.mxu0 %v2813_v0 }
 0x15f   :  { %2308 = vmatpush3.bf16.msra.mxu1 %v2967_v36  ;;  %2332 = vmatpush3.bf16.msra.mxu0 %v2955_v27 }
 0x160   :  { %2309 = vmatprep.subr.bf16.mxu1 %v2813_v0  ;;  %2333 = vmatprep.subr.bf16.mxu0 %v2813_v0 }
 0x163   :  { %2311 = vmatpush3.bf16.msra.mxu1 %v3000_v44  ;;  %2335 = vmatpush3.bf16.msra.mxu0 %v2963_v33 }
 0x164   :  { %2312 = vmatprep.subr.bf16.mxu1 %v2813_v0  ;;  %2336 = vmatprep.subr.bf16.mxu0 %v2813_v0 }
 0x167   :  { %2314 = vmatpush3.bf16.msra.mxu1 %v3004_v47  ;;  %2338 = vmatpush3.bf16.msra.mxu0 %v2971_v37 }
 0x168   :  { %2315 = vmatprep.subr.bf16.mxu1 %v2813_v0  ;;  %2339 = vmatprep.subr.bf16.mxu0 %v2813_v0 }
 0x16b   :  { %2317 = vmatpush3.bf16.msra.mxu1 %v3007_v50  ;;  %2341 = vmatpush3.bf16.msra.mxu0 %v2977_v40 }
 0x16c   :  { %2342 = vmatprep.subr.bf16.mxu1 %v2813_v0  ;;  %2366 = vmatprep.subr.bf16.mxu0 %v2813_v0 }
 0x221   :  { %v255_v58 = vpop.f32.mrb[0].mxu1  ;;  %v338_v59 = vpop.f32.mrb[2].mxu0 }
 0x222   :  { %v3054_v60 = vadd.f32 %v3051_v56, %v255_v58  ;;  %v339_v61 = vadd.f32 %v338_v59, %v271_v57  ;;  %v1731_v62 = vpop.f32.mrb[1].mxu1  ;;  %v1766_v63 = vpop.f32.mrb[3].mxu0 }
 0x224   :  { %2619 = vtanh.f32 %v339_v61  ;;  %259 = vmax.xlane.f32.xlu0 %v3054_v60 }
 0x22e   :  { %v2620_v2 = vpop.eup %2619 }
 0x22f   :  { %1800 = vmatmul.mubr.f32.vlgmr.msra.gmra.mrb[2].mxu1 %v2620_v2  ;;  %1835 = vmatmul.mubr.f32.vlgmr.msra.gmra.mrb[4].mxu0 %v2620_v2 }
 0x230   :  { %2344 = vmatpush3.bf16.msra.mxu1 %v2939_v15  ;;  %2368 = vmatpush3.bf16.msra.mxu0 %v2930_v5 }
 0x231   :  { %2345 = vmatprep.subr.bf16.mxu1 %v2813_v0  ;;  %2369 = vmatprep.subr.bf16.mxu0 %v2813_v0 }
 0x232   :  { %1869 = vmatprep.mubr.msk.f32.mxu1 %vm2814_vm0, %v2815_v1  ;;  %1904 = vmatprep.mubr.msk.f32.mxu0 %vm2814_vm0, %v2815_v1 }
 0x234   :  { %2347 = vmatpush3.bf16.msra.mxu1 %v2943_v18  ;;  %2371 = vmatpush3.bf16.msra.mxu0 %v2933_v7 }
 0x235   :  { %2348 = vmatprep.subr.bf16.mxu1 %v2813_v0  ;;  %2372 = vmatprep.subr.bf16.mxu0 %v2813_v0 }
 0x238   :  { %2350 = vmatpush3.bf16.msra.mxu1 %v2951_v24  ;;  %2374 = vmatpush3.bf16.msra.mxu0 %v2937_v14 }
 0x239   :  { %2351 = vmatprep.subr.bf16.mxu1 %v2813_v0  ;;  %2375 = vmatprep.subr.bf16.mxu0 %v2813_v0 }
 0x23c   :  { %2353 = vmatpush3.bf16.msra.mxu1 %v2959_v30  ;;  %2377 = vmatpush3.bf16.msra.mxu0 %v2947_v21 }
 0x23d   :  { %2354 = vmatprep.subr.bf16.mxu1 %v2813_v0  ;;  %2378 = vmatprep.subr.bf16.mxu0 %v2813_v0 }
 0x240   :  { %2356 = vmatpush3.bf16.msra.mxu1 %v2967_v36  ;;  %2380 = vmatpush3.bf16.msra.mxu0 %v2955_v27 }
 0x241   :  { %2357 = vmatprep.subr.bf16.mxu1 %v2813_v0  ;;  %2381 = vmatprep.subr.bf16.mxu0 %v2813_v0 }
 0x244   :  { %2359 = vmatpush3.bf16.msra.mxu1 %v3000_v44  ;;  %2383 = vmatpush3.bf16.msra.mxu0 %v2963_v33 }
 0x245   :  { %2360 = vmatprep.subr.bf16.mxu1 %v2813_v0  ;;  %2384 = vmatprep.subr.bf16.mxu0 %v2813_v0 }
 0x248   :  { %2362 = vmatpush3.bf16.msra.mxu1 %v3004_v47  ;;  %2386 = vmatpush3.bf16.msra.mxu0 %v2971_v37 }
 0x249   :  { %2363 = vmatprep.subr.bf16.mxu1 %v2813_v0  ;;  %2387 = vmatprep.subr.bf16.mxu0 %v2813_v0 }
 0x24c   :  { %2365 = vmatpush3.bf16.msra.mxu1 %v3007_v50  ;;  %2389 = vmatpush3.bf16.msra.mxu0 %v2977_v40 }
 0x24d   :  { %2390 = vmatprep.subr.bf16.mxu1 %v2813_v0  ;;  %2414 = vmatprep.subr.bf16.mxu0 %v2813_v0 }
 0x302   :  { %v409_v4 = vpop.f32.mrb[2].mxu1  ;;  %v493_v6 = vpop.f32.mrb[4].mxu0 }
 0x303   :  { %v3094_v8 = vadd.f32 %v3051_v56, %v409_v4  ;;  %v494_v9 = vadd.f32 %v493_v6, %v426_v3  ;;  %v1801_v10 = vpop.f32.mrb[3].mxu1  ;;  %v1836_v11 = vpop.f32.mrb[5].mxu0 }
 0x305   :  { %2621 = vtanh.f32 %v494_v9  ;;  %413 = vmax.xlane.f32.xlu0 %v3094_v8 }
 0x30f   :  { %v2622_v12 = vpop.eup %2621 }
 0x310   :  { %1870 = vmatmul.mubr.f32.vlgmr.msra.gmra.mrb[4].mxu1 %v2622_v12  ;;  %1905 = vmatmul.mubr.f32.vlgmr.msra.gmra.mrb[6].mxu0 %v2622_v12 }
 0x311   :  { %2392 = vmatpush3.bf16.msra.mxu1 %v2939_v15  ;;  %2416 = vmatpush3.bf16.msra.mxu0 %v2930_v5 }
 0x312   :  { %2393 = vmatprep.subr.bf16.mxu1 %v2813_v0  ;;  %2417 = vmatprep.subr.bf16.mxu0 %v2813_v0 }
 0x313   :  { %1939 = vmatprep.mubr.msk.f32.mxu1 %vm2814_vm0, %v2815_v1  ;;  %1974 = vmatprep.mubr.msk.f32.mxu0 %vm2814_vm0, %v2815_v1 }
 0x315   :  { %2395 = vmatpush3.bf16.msra.mxu1 %v2943_v18  ;;  %2419 = vmatpush3.bf16.msra.mxu0 %v2933_v7 }
 0x316   :  { %2396 = vmatprep.subr.bf16.mxu1 %v2813_v0  ;;  %2420 = vmatprep.subr.bf16.mxu0 %v2813_v0 }
 0x319   :  { %2398 = vmatpush3.bf16.msra.mxu1 %v2951_v24  ;;  %2422 = vmatpush3.bf16.msra.mxu0 %v2937_v14 }
 0x31a   :  { %2399 = vmatprep.subr.bf16.mxu1 %v2813_v0  ;;  %2423 = vmatprep.subr.bf16.mxu0 %v2813_v0 }
 0x31d   :  { %2401 = vmatpush3.bf16.msra.mxu1 %v2959_v30  ;;  %2425 = vmatpush3.bf16.msra.mxu0 %v2947_v21 }
 0x31e   :  { %2402 = vmatprep.subr.bf16.mxu1 %v2813_v0  ;;  %2426 = vmatprep.subr.bf16.mxu0 %v2813_v0 }
 0x321   :  { %2404 = vmatpush3.bf16.msra.mxu1 %v2967_v36  ;;  %2428 = vmatpush3.bf16.msra.mxu0 %v2955_v27 }
 0x322   :  { %2405 = vmatprep.subr.bf16.mxu1 %v2813_v0  ;;  %2429 = vmatprep.subr.bf16.mxu0 %v2813_v0 }
 0x325   :  { %2407 = vmatpush3.bf16.msra.mxu1 %v3000_v44  ;;  %2431 = vmatpush3.bf16.msra.mxu0 %v2963_v33 }
 0x326   :  { %2408 = vmatprep.subr.bf16.mxu1 %v2813_v0  ;;  %2432 = vmatprep.subr.bf16.mxu0 %v2813_v0 }
 0x329   :  { %2410 = vmatpush3.bf16.msra.mxu1 %v3004_v47  ;;  %2434 = vmatpush3.bf16.msra.mxu0 %v2971_v37 }
 0x32a   :  { %2411 = vmatprep.subr.bf16.mxu1 %v2813_v0  ;;  %2435 = vmatprep.subr.bf16.mxu0 %v2813_v0 }
 0x32d   :  { %2413 = vmatpush3.bf16.msra.mxu1 %v3007_v50  ;;  %2437 = vmatpush3.bf16.msra.mxu0 %v2977_v40 }
 0x32e   :  { %2438 = vmatprep.subr.bf16.mxu1 %v2813_v0  ;;  %2462 = vmatprep.subr.bf16.mxu0 %v2813_v0 }
 0x3e3   :  { %v564_v16 = vpop.f32.mrb[4].mxu1  ;;  %v648_v17 = vpop.f32.mrb[6].mxu0 }
 0x3e4   :  { %v3134_v19 = vadd.f32 %v3051_v56, %v564_v16  ;;  %v649_v20 = vadd.f32 %v648_v17, %v581_v13  ;;  %v1871_v22 = vpop.f32.mrb[5].mxu1  ;;  %v1906_v23 = vpop.f32.mrb[7].mxu0 }
 0x3e6   :  { %2623 = vtanh.f32 %v649_v20  ;;  %568 = vmax.xlane.f32.xlu1 %v3134_v19 }
 0x3f0   :  { %v2624_v25 = vpop.eup %2623 }
 0x3f1   :  { %1940 = vmatmul.mubr.f32.vlgmr.msra.gmra.mrb[6].mxu1 %v2624_v25  ;;  %1975 = vmatmul.mubr.f32.vlgmr.msra.gmra.mrb[8].mxu0 %v2624_v25 }
 0x3f2   :  { %2440 = vmatpush3.bf16.msra.mxu1 %v2939_v15  ;;  %2464 = vmatpush3.bf16.msra.mxu0 %v2930_v5 }
 0x3f3   :  { %2441 = vmatprep.subr.bf16.mxu1 %v2813_v0  ;;  %2465 = vmatprep.subr.bf16.mxu0 %v2813_v0 }
 0x3f4   :  { %2009 = vmatprep.mubr.msk.f32.mxu1 %vm2814_vm0, %v2815_v1  ;;  %2044 = vmatprep.mubr.msk.f32.mxu0 %vm2814_vm0, %v2815_v1 }
 0x3f6   :  { %2443 = vmatpush3.bf16.msra.mxu1 %v2943_v18  ;;  %2467 = vmatpush3.bf16.msra.mxu0 %v2933_v7 }
 0x3f7   :  { %2444 = vmatprep.subr.bf16.mxu1 %v2813_v0  ;;  %2468 = vmatprep.subr.bf16.mxu0 %v2813_v0 }
 0x3fa   :  { %2446 = vmatpush3.bf16.msra.mxu1 %v2951_v24  ;;  %2470 = vmatpush3.bf16.msra.mxu0 %v2937_v14 }
 0x3fb   :  { %2447 = vmatprep.subr.bf16.mxu1 %v2813_v0  ;;  %2471 = vmatprep.subr.bf16.mxu0 %v2813_v0 }
 0x3fe   :  { %2449 = vmatpush3.bf16.msra.mxu1 %v2959_v30  ;;  %2473 = vmatpush3.bf16.msra.mxu0 %v2947_v21 }
 0x3ff   :  { %2450 = vmatprep.subr.bf16.mxu1 %v2813_v0  ;;  %2474 = vmatprep.subr.bf16.mxu0 %v2813_v0 }
 0x402   :  { %2452 = vmatpush3.bf16.msra.mxu1 %v2967_v36  ;;  %2476 = vmatpush3.bf16.msra.mxu0 %v2955_v27 }
 0x403   :  { %2453 = vmatprep.subr.bf16.mxu1 %v2813_v0  ;;  %2477 = vmatprep.subr.bf16.mxu0 %v2813_v0 }
 0x406   :  { %2455 = vmatpush3.bf16.msra.mxu1 %v3000_v44  ;;  %2479 = vmatpush3.bf16.msra.mxu0 %v2963_v33 }
 0x407   :  { %2456 = vmatprep.subr.bf16.mxu1 %v2813_v0  ;;  %2480 = vmatprep.subr.bf16.mxu0 %v2813_v0 }
 0x40a   :  { %2458 = vmatpush3.bf16.msra.mxu1 %v3004_v47  ;;  %2482 = vmatpush3.bf16.msra.mxu0 %v2971_v37 }
 0x40b   :  { %2459 = vmatprep.subr.bf16.mxu1 %v2813_v0  ;;  %2483 = vmatprep.subr.bf16.mxu0 %v2813_v0 }
 0x40e   :  { %2461 = vmatpush3.bf16.msra.mxu1 %v3007_v50  ;;  %2485 = vmatpush3.bf16.msra.mxu0 %v2977_v40 }
 0x40f   :  { %2486 = vmatprep.subr.bf16.mxu1 %v2813_v0  ;;  %2510 = vmatprep.subr.bf16.mxu0 %v2813_v0 }
 0x4c4   :  { %v719_v28 = vpop.f32.mrb[6].mxu1  ;;  %v803_v29 = vpop.f32.mrb[8].mxu0 }
 0x4c5   :  { %v3174_v31 = vadd.f32 %v3051_v56, %v719_v28  ;;  %v804_v32 = vadd.f32 %v803_v29, %v736_v26  ;;  %v1941_v34 = vpop.f32.mrb[7].mxu1  ;;  %v1976_v35 = vpop.f32.mrb[9].mxu0 }
 0x4c7   :  { %2625 = vtanh.f32 %v804_v32  ;;  %723 = vmax.xlane.f32.xlu1 %v3174_v31 }
 0x4d1   :  { %v2626_v38 = vpop.eup %2625 }
 0x4d2   :  { %2010 = vmatmul.mubr.f32.vlgmr.msra.gmra.mrb[8].mxu1 %v2626_v38  ;;  %2045 = vmatmul.mubr.f32.vlgmr.msra.gmra.mrb[10].mxu0 %v2626_v38 }
 0x4d3   :  { %2488 = vmatpush3.bf16.msra.mxu1 %v2939_v15  ;;  %2512 = vmatpush3.bf16.msra.mxu0 %v2930_v5 }
 0x4d4   :  { %2489 = vmatprep.subr.bf16.mxu1 %v2813_v0  ;;  %2513 = vmatprep.subr.bf16.mxu0 %v2813_v0 }
 0x4d5   :  { %2079 = vmatprep.mubr.msk.f32.mxu1 %vm2814_vm0, %v2815_v1  ;;  %2114 = vmatprep.mubr.msk.f32.mxu0 %vm2814_vm0, %v2815_v1 }
 0x4d7   :  { %2491 = vmatpush3.bf16.msra.mxu1 %v2943_v18  ;;  %2515 = vmatpush3.bf16.msra.mxu0 %v2933_v7 }
 0x4d8   :  { %2492 = vmatprep.subr.bf16.mxu1 %v2813_v0  ;;  %2516 = vmatprep.subr.bf16.mxu0 %v2813_v0 }
 0x4db   :  { %2494 = vmatpush3.bf16.msra.mxu1 %v2951_v24  ;;  %2518 = vmatpush3.bf16.msra.mxu0 %v2937_v14 }
 0x4dc   :  { %2495 = vmatprep.subr.bf16.mxu1 %v2813_v0  ;;  %2519 = vmatprep.subr.bf16.mxu0 %v2813_v0 }
 0x4df   :  { %2497 = vmatpush3.bf16.msra.mxu1 %v2959_v30  ;;  %2521 = vmatpush3.bf16.msra.mxu0 %v2947_v21 }
 0x4e0   :  { %2498 = vmatprep.subr.bf16.mxu1 %v2813_v0  ;;  %2522 = vmatprep.subr.bf16.mxu0 %v2813_v0 }
 0x4e3   :  { %2500 = vmatpush3.bf16.msra.mxu1 %v2967_v36  ;;  %2524 = vmatpush3.bf16.msra.mxu0 %v2955_v27 }
 0x4e4   :  { %2501 = vmatprep.subr.bf16.mxu1 %v2813_v0  ;;  %2525 = vmatprep.subr.bf16.mxu0 %v2813_v0 }
 0x4e7   :  { %2503 = vmatpush3.bf16.msra.mxu1 %v3000_v44  ;;  %2527 = vmatpush3.bf16.msra.mxu0 %v2963_v33 }
 0x4e8   :  { %2504 = vmatprep.subr.bf16.mxu1 %v2813_v0  ;;  %2528 = vmatprep.subr.bf16.mxu0 %v2813_v0 }
 0x4eb   :  { %2506 = vmatpush3.bf16.msra.mxu1 %v3004_v47  ;;  %2530 = vmatpush3.bf16.msra.mxu0 %v2971_v37 }
 0x4ec   :  { %2507 = vmatprep.subr.bf16.mxu1 %v2813_v0  ;;  %2531 = vmatprep.subr.bf16.mxu0 %v2813_v0 }
 0x4ef   :  { %2509 = vmatpush3.bf16.msra.mxu1 %v3007_v50  ;;  %2533 = vmatpush3.bf16.msra.mxu0 %v2977_v40 }
 0x4f0   :  { %2534 = vmatprep.subr.bf16.mxu1 %v2813_v0  ;;  %2558 = vmatprep.subr.bf16.mxu0 %v2813_v0 }
 0x5a5   :  { %v874_v41 = vpop.f32.mrb[8].mxu1  ;;  %v958_v42 = vpop.f32.mrb[10].mxu0 }
 0x5a6   :  { %v3214_v43 = vadd.f32 %v3051_v56, %v874_v41  ;;  %v959_v45 = vadd.f32 %v958_v42, %v891_v39  ;;  %v2011_v46 = vpop.f32.mrb[9].mxu1  ;;  %v2046_v48 = vpop.f32.mrb[11].mxu0 }
 0x5a8   :  { %2627 = vtanh.f32 %v959_v45  ;;  %878 = vmax.xlane.f32.xlu0 %v3214_v43 }
 0x5b2   :  { %v2628_v49 = vpop.eup %2627 }
 0x5b3   :  { %2080 = vmatmul.mubr.f32.vlgmr.msra.gmra.mrb[10].mxu1 %v2628_v49  ;;  %2115 = vmatmul.mubr.f32.vlgmr.msra.gmra.mrb[12].mxu0 %v2628_v49 }
 0x5b4   :  { %2536 = vmatpush3.bf16.msra.mxu1 %v2939_v15  ;;  %2560 = vmatpush3.bf16.msra.mxu0 %v2930_v5  ;;  %v1046_v5 = vld [vmem:[#allocation2 + $0x30] sm:$0xff] }
 0x5b5   :  { %2537 = vmatprep.subr.bf16.mxu1 %v2813_v0  ;;  %2561 = vmatprep.subr.bf16.mxu0 %v2813_v0 }
 0x5b6   :  { %2149 = vmatprep.mubr.msk.f32.mxu1 %vm2814_vm0, %v2815_v1  ;;  %2184 = vmatprep.mubr.msk.f32.mxu0 %vm2814_vm0, %v2815_v1 }
 0x5b8   :  { %2539 = vmatpush3.bf16.msra.mxu1 %v2943_v18  ;;  %2563 = vmatpush3.bf16.msra.mxu0 %v2933_v7 }
 0x5b9   :  { %2540 = vmatprep.subr.bf16.mxu1 %v2813_v0  ;;  %2564 = vmatprep.subr.bf16.mxu0 %v2813_v0 }
 0x5bc   :  { %2542 = vmatpush3.bf16.msra.mxu1 %v2951_v24  ;;  %2566 = vmatpush3.bf16.msra.mxu0 %v2937_v14 }
 0x5bd   :  { %2543 = vmatprep.subr.bf16.mxu1 %v2813_v0  ;;  %2567 = vmatprep.subr.bf16.mxu0 %v2813_v0 }
 0x5c0   :  { %2545 = vmatpush3.bf16.msra.mxu1 %v2959_v30  ;;  %2569 = vmatpush3.bf16.msra.mxu0 %v2947_v21 }
 0x5c1   :  { %2546 = vmatprep.subr.bf16.mxu1 %v2813_v0  ;;  %2570 = vmatprep.subr.bf16.mxu0 %v2813_v0 }
 0x5c4   :  { %2548 = vmatpush3.bf16.msra.mxu1 %v2967_v36  ;;  %2572 = vmatpush3.bf16.msra.mxu0 %v2955_v27 }
 0x5c5   :  { %2549 = vmatprep.subr.bf16.mxu1 %v2813_v0  ;;  %2573 = vmatprep.subr.bf16.mxu0 %v2813_v0 }
 0x5c8   :  { %2551 = vmatpush3.bf16.msra.mxu1 %v3000_v44  ;;  %2575 = vmatpush3.bf16.msra.mxu0 %v2963_v33 }
 0x5c9   :  { %2552 = vmatprep.subr.bf16.mxu1 %v2813_v0  ;;  %2576 = vmatprep.subr.bf16.mxu0 %v2813_v0 }
 0x5cc   :  { %2554 = vmatpush3.bf16.msra.mxu1 %v3004_v47  ;;  %2578 = vmatpush3.bf16.msra.mxu0 %v2971_v37 }
 0x5cd   :  { %2555 = vmatprep.subr.bf16.mxu1 %v2813_v0  ;;  %2579 = vmatprep.subr.bf16.mxu0 %v2813_v0 }
 0x5d0   :  { %2557 = vmatpush3.bf16.msra.mxu1 %v3007_v50  ;;  %2581 = vmatpush3.bf16.msra.mxu0 %v2977_v40 }
 0x5d1   :  { %2582 = vmatprep.subr.bf16.mxu1 %v2813_v0 }
 0x686   :  { %v1029_v7 = vpop.f32.mrb[10].mxu1  ;;  %v1113_v14 = vpop.f32.mrb[12].mxu0 }
 0x687   :  { %v3253_v21 = vadd.f32 %v3051_v56, %v1029_v7  ;;  %v1114_v27 = vadd.f32 %v1113_v14, %v1046_v5  ;;  %v2081_v33 = vpop.f32.mrb[11].mxu1  ;;  %v2116_v51 = vpop.f32.mrb[13].mxu0 }
 0x689   :  { %2629 = vtanh.f32 %v1114_v27  ;;  %1033 = vmax.xlane.f32.xlu1 %v3253_v21 }
 0x693   :  { %v2630_v37 = vpop.eup %2629 }
 0x694   :  { %2150 = vmatmul.mubr.f32.vlgmr.msra.gmra.mrb[12].mxu1 %v2630_v37  ;;  %2185 = vmatmul.mubr.f32.vlgmr.msra.gmra.mrb[14].mxu0 %v2630_v37 }
 0x695   :  { %2584 = vmatpush3.bf16.msra.mxu1 %v2939_v15  ;;  %2219 = vmatprep.mubr.msk.f32.mxu1 %vm2814_vm0, %v2815_v1  ;;  %v260_v1 = vpop.xlane.xlu0 %259 }
 0x696   :  { %2585 = vmatprep.subr.bf16.mxu1 %v2813_v0  ;;  %v261_v15 = vsub.f32 %v3054_v60, %v260_v1 }
 0x699   :  { %2587 = vmatpush3.bf16.msra.mxu1 %v2943_v18  ;;  %v414_v18 = vpop.xlane.xlu0 %413 }
 0x69a   :  { %2588 = vmatprep.subr.bf16.mxu1 %v2813_v0  ;;  %v415_v25 = vsub.f32 %v3094_v8, %v414_v18 }
 0x69c   :  { %v416_v28 = vmul.f32 1.442695, %v415_v25 }
 0x69d   :  { %2590 = vmatpush3.bf16.msra.mxu1 %v2951_v24  ;;  %v569_v24 = vpop.xlane.xlu1 %568  ;;  %v879_v40 = vpop.xlane.xlu0 %878 }
 0x69e   :  { %2591 = vmatprep.subr.bf16.mxu1 %v2813_v0 }
 0x6a1   :  { %2593 = vmatpush3.bf16.msra.mxu1 %v2959_v30  ;;  %v262_v30 = vmul.f32 1.442695, %v261_v15  ;;  %v724_v26 = vpop.xlane.xlu1 %723 }
 0x6a2   :  { %2594 = vmatprep.subr.bf16.mxu1 %v2813_v0  ;;  %v725_v29 = vsub.f32 %v3174_v31, %v724_v26 }
 0x6a3   :  { %2631 = vpow2.f32 %v262_v30 }
 0x6a4   :  { %v726_v34 = vmul.f32 1.442695, %v725_v29 }
 0x6a5   :  { %2596 = vmatpush3.bf16.msra.mxu1 %v2967_v36  ;;  %v570_v36 = vsub.f32 %v3134_v19, %v569_v24 }
 0x6a6   :  { %2597 = vmatprep.subr.bf16.mxu1 %v2813_v0 }
 0x6a7   :  { %v571_v52 = vmul.f32 1.442695, %v570_v36 }
 0x6a9   :  { %2599 = vmatpush3.bf16.msra.mxu1 %v3000_v44  ;;  %v880_v44 = vsub.f32 %v3214_v43, %v879_v40  ;;  %2633 = vpow2.f32 %v571_v52 }
 0x6aa   :  { %2600 = vmatprep.subr.bf16.mxu1 %v2813_v0 }
 0x6ad   :  { %2602 = vmatpush3.bf16.msra.mxu1 %v3004_v47  ;;  %v881_v47 = vmul.f32 1.442695, %v880_v44  ;;  %v2632_v59 = vpop.eup %2631 }
 0x6ae   :  { %2603 = vmatprep.subr.bf16.mxu1 %v2813_v0 }
 0x6b1   :  { %2605 = vmatpush3.bf16.msra.mxu1 %v3007_v50 }
 0x6b3   :  { %v2634_v60 = vpop.eup %2633 }
 0x716   :  { %v1034_v32 = vpop.xlane.xlu1 %1033 }
 0x717   :  { %v1035_v35 = vsub.f32 %v3253_v21, %v1034_v32 }
 0x719   :  { %v1036_v38 = vmul.f32 1.442695, %v1035_v35 }
 0x767   :  { %v1184_v54 = vpop.f32.mrb[12].mxu1  ;;  %v1268_v0 = vpop.f32.mrb[14].mxu0 }
 0x768   :  { %v1185_v50 = vadd.f32 %v3051_v56, %v1184_v54  ;;  %v1269_v55 = vadd.f32 %v1268_v0, %v1201_v53  ;;  %v2151_v57 = vpop.f32.mrb[13].mxu1  ;;  %v2186_v58 = vpop.f32.mrb[15].mxu0 }
 0x76a   :  { %2635 = vtanh.f32 %v1269_v55  ;;  %1188 = vmax.xlane.f32.xlu0 %v1185_v50 }
 0x76b   :  { %2637 = vpow2.f32 %v881_v47 }
 0x76e   :  { %264 = vadd.xlane.f32.xlu0 %v2632_v59 }
 0x772   :  { %573 = vadd.xlane.f32.xlu0 %v2634_v60 }
 0x774   :  { %v2636_v61 = vpop.eup %2635 }
 0x775   :  { %v2638_v62 = vpop.eup %2637  ;;  %1355 = vst [vmem:[#allocation11] sm:$0xff] %v2636_v61  ;;  %2220 = vmatmul.mubr.f32.vlgmr.msra.gmra.mrb[14].mxu1 %v2636_v61 }
 0x776   :  { %883 = vadd.xlane.f32.xlu0 %v2638_v62 }
 0x7f7   :  { %v1189_v63 = vpop.xlane.xlu0 %1188 }
 0x7f8   :  { %v1190_v2 = vsub.f32 %v1185_v50, %v1189_v63 }
 0x7fa   :  { %v1191_v3 = vmul.f32 1.442695, %v1190_v2 }
 0x7fb   :  { %v265_v4 = vpop.xlane.xlu0 %264 }
 0x7fc   :  { %2639 = vpow2.f32 %v1191_v3 }
 0x7fd   :  { %2641 = vlog2.f32 %v265_v4 }
 0x7ff   :  { %v574_v6 = vpop.xlane.xlu0 %573 }
 0x800   :  { %2643 = vlog2.f32 %v574_v6 }
 0x803   :  { %v884_v9 = vpop.xlane.xlu0 %883 }
 0x804   :  { %2645 = vlog2.f32 %v884_v9 }
 0x805   :  { %2647 = vpow2.f32 %v416_v28 }
 0x806   :  { %v2640_v10 = vpop.eup %2639  ;;  %2649 = vpow2.f32 %v726_v34 }
 0x807   :  { %v2642_v11 = vpop.eup %2641  ;;  %1193 = vadd.xlane.f32.xlu0 %v2640_v10  ;;  %2651 = vpow2.f32 %v1036_v38 }
 0x808   :  { %v267_v12 = vmul.f32 0.6931472, %v2642_v11 }
 0x80a   :  { %v2644_v13 = vpop.eup %2643  ;;  %v268_v16 = vsub.f32 %v261_v15, %v267_v12 }
 0x80b   :  { %v576_v17 = vmul.f32 0.6931472, %v2644_v13 }
 0x80c   :  { %269 = vst [vmem:[#allocation10] sm:$0xff] %v268_v16 }
 0x80d   :  { %v577_v19 = vsub.f32 %v570_v36, %v576_v17 }
 0x80e   :  { %v2646_v20 = vpop.eup %2645 }
 0x80f   :  { %579 = vst [vmem:[#allocation10 + $0x10] sm:$0xff] %v577_v19  ;;  %v886_v22 = vmul.f32 0.6931472, %v2646_v20  ;;  %v2648_v43 = vpop.eup %2647 }
 0x810   :  { %v2650_v8 = vpop.eup %2649 }
 0x811   :  { %v887_v23 = vsub.f32 %v880_v44, %v886_v22  ;;  %v2652_v45 = vpop.eup %2651 }
 0x813   :  { %889 = vst [vmem:[#allocation10 + $0x20] sm:$0xff] %v887_v23 }
 0x848   :  { %v1339_v39 = vpop.f32.mrb[14].mxu1 }
 0x849   :  { %v1340_v41 = vadd.f32 %v3051_v56, %v1339_v39  ;;  %v2221_v42 = vpop.f32.mrb[15].mxu1 }
 0x84b   :  { %1343 = vmax.xlane.f32.xlu1 %v1340_v41 }
 0x84f   :  { %418 = vadd.xlane.f32.xlu1 %v2648_v43 }
 0x853   :  { %728 = vadd.xlane.f32.xlu1 %v2650_v8 }
 0x857   :  { %1038 = vadd.xlane.f32.xlu1 %v2652_v45 }
 0x894   :  { %v1194_v31 = vpop.xlane.xlu0 %1193 }
 0x895   :  { %2653 = vlog2.f32 %v1194_v31 }
 0x89f   :  { %v2654_v46 = vpop.eup %2653 }
 0x8a0   :  { %v1196_v48 = vmul.f32 0.6931472, %v2654_v46 }
 0x8a2   :  { %v1197_v49 = vsub.f32 %v1190_v2, %v1196_v48 }
 0x8a4   :  { %1199 = vst [vmem:[#allocation10 + $0x30] sm:$0xff] %v1197_v49 }
 0x8d8   :  { %v1344_v5 = vpop.xlane.xlu1 %1343 }
 0x8d9   :  { %v1345_v7 = vsub.f32 %v1340_v41, %v1344_v5 }
 0x8db   :  { %v1346_v14 = vmul.f32 1.442695, %v1345_v7 }
 0x8dc   :  { %v419_v21 = vpop.xlane.xlu1 %418 }
 0x8dd   :  { %2655 = vpow2.f32 %v1346_v14 }
 0x8de   :  { %2657 = vlog2.f32 %v419_v21 }
 0x8e0   :  { %v729_v56 = vpop.xlane.xlu1 %728 }
 0x8e1   :  { %2659 = vlog2.f32 %v729_v56 }
 0x8e4   :  { %v1039_v27 = vpop.xlane.xlu1 %1038 }
 0x8e5   :  { %2661 = vlog2.f32 %v1039_v27 }
 0x8e7   :  { %v2656_v33 = vpop.eup %2655 }
 0x8e8   :  { %v2658_v51 = vpop.eup %2657  ;;  %1348 = vadd.xlane.f32.xlu1 %v2656_v33 }
 0x8e9   :  { %v421_v37 = vmul.f32 0.6931472, %v2658_v51 }
 0x8eb   :  { %v2660_v1 = vpop.eup %2659  ;;  %v422_v15 = vsub.f32 %v415_v25, %v421_v37 }
 0x8ec   :  { %v731_v18 = vmul.f32 0.6931472, %v2660_v1 }
 0x8ed   :  { %424 = vst [vmem:[#allocation10 + $0x8] sm:$0xff] %v422_v15 }
 0x8ee   :  { %v732_v24 = vsub.f32 %v725_v29, %v731_v18 }
 0x8ef   :  { %v2662_v30 = vpop.eup %2661 }
 0x8f0   :  { %734 = vst [vmem:[#allocation10 + $0x18] sm:$0xff] %v732_v24  ;;  %v1041_v36 = vmul.f32 0.6931472, %v2662_v30 }
 0x8f2   :  { %v1042_v40 = vsub.f32 %v1035_v35, %v1041_v36 }
 0x8f4   :  { %1044 = vst [vmem:[#allocation10 + $0x28] sm:$0xff] %v1042_v40 }
 0x8f5   :  { %2764 = shalt.err (!%p2761_p8)
}
 0x8f6   :  { %s2765_s27 = scalar_lea.hbm %s3314_s6, 128 }
 0x8f7   :  { %p2766_p9 = scmp.ne.s32.totalorder %s3314_s6, %s2765_s27  ;;  %p2769_p10 = scmp.lt.u32.totalorder %s2765_s27, %s3314_s6 }
 0x8f9   :  { %p2771_p11 = pnand %p2769_p10, %p2766_p9 }
 0x8fb   :  { %2774 = shalt.err (!%p2771_p11)
}
 0x8fc   :  { %1377 = dma.vmem_to_hbm [thread:$0]  %s1375_s22, 128, %s3314_s6, [#allocation12]  }
 0x8fd   :  { %s2817_s0 = smov [#allocation10]  }
 0x8fe   :  { %s1361_s24 = sshll.u32 %s2817_s0, 4  ;;  %s1362_s24 = int_to_ptr.vmem [resolvable:$true] %s1361_s24 }
 0x8ff   :  { %s2775_s10 = scalar_lea.vmem %s1362_s24, 1024  ;;  %p2780_p13 = scmp.lt.s32.totalorder %s1362_s24, %s1362_s24 }
 0x900   :  { %p2776_p12 = scmp.ne.s32.totalorder %s1362_s24, %s2775_s10  ;;  %p2781_p0 = scmp.lt.s32.totalorder %s2775_s10, %s2775_s10 }
 0x902   :  { %p2782_p1 = por %p2781_p0, %p2780_p13 }
 0x904   :  { %p2783_p2 = pnand %p2782_p1, %p2776_p12 }
 0x975   :  { %v1349_v52 = vpop.xlane.xlu1 %1348 }
 0x976   :  { %2663 = vlog2.f32 %v1349_v52 }
 0x980   :  { %v2664_v44 = vpop.eup %2663 }
 0x981   :  { %v1351_v53 = vmul.f32 0.6931472, %v2664_v44 }
 0x983   :  { %v1352_v47 = vsub.f32 %v1345_v7, %v1351_v53 }
 0x985   :  { %1354 = vst [vmem:[#allocation10 + $0x38] sm:$0xff] %v1352_v47 }
 0x986   :  { %2786 = shalt.err (!%p2783_p2)
}
 0x987   :  { %s2787_s6 = scalar_lea.hbm %s3313_s5, 1024 }
 0x988   :  { %p2788_p3 = scmp.ne.s32.totalorder %s3313_s5, %s2787_s6  ;;  %p2791_p4 = scmp.lt.u32.totalorder %s2787_s6, %s3313_s5 }
 0x98a   :  { %p2793_p5 = pnand %p2791_p4, %p2788_p3 }
 0x98c   :  { %2796 = shalt.err (!%p2793_p5)
}
 0x98d   :  { %1367 = dma.vmem_to_hbm [thread:$0]  %s1362_s24, 1024, %s3313_s5, [#allocation4], %s2809_s1, %s2809_s1, %s2810_s19  }
 0x98e   :  { %2803 = dma.done.wait [#allocation4], 1024  }
 0x98f   :  { %2804 = vsyncadd [#allocation4], 4294966272 }
 0x990   :  { %2805 = dma.done.wait [#allocation12], 128  }
 0x991   :  { %2806 = vsyncadd [#allocation12], 4294967168 }
 0x992   :  { %1384 = vsyncpa [#allocation3], 1 }
 0x993   :  { %1385 = vsyncpa [#allocation6], 1 }
 0x994   :  { %1386 = vsyncpa [#allocation9], 1 }
 0x995   :  { %1387 = vsyncpa [#allocation4], 1 }
 0x996   :  { %1388 = vsyncpa [#allocation12], 1 }

</bundles_post_ra>
